<compile_context>
chip_gen: v7x
topology: tpu7x:2x2x1
jax: 0.10.0
libtpu: 0.0.40
codegen_flags: <defaults>
</compile_context>

<pallas_src>
import jax
import jax.numpy as jnp
from jax.experimental import pallas as pl
from jax.experimental.pallas import tpu as pltpu


def _round_up(n, m):
    return ((n + m - 1) // m) * m


def _mlp_kernel(x_ref, w1_ref, b1_ref, w2_ref, b2_ref, w3_ref, b3_ref, out_ref):
    # x_ref: (TB, Din) in native dtype; w*: (in, out) already in the MXU compute dtype
    # (bf16 by default); b*: (1, out) f32; out_ref: (TB, Dout_pad).
    cdt = w1_ref.dtype
    x = x_ref[...].astype(cdt)                                   # VPU cast, hidden under MXU

    h = jnp.dot(x, w1_ref[...], preferred_element_type=jnp.float32)
    h = jnp.maximum(h + b1_ref[...], 0.0)                        # fc1 + ReLU (f32)

    h = jnp.dot(h.astype(cdt), w2_ref[...], preferred_element_type=jnp.float32)
    h = jnp.maximum(h + b2_ref[...], 0.0)                        # fc2 + ReLU (f32)

    y = jnp.dot(h.astype(cdt), w3_ref[...], preferred_element_type=jnp.float32)
    y = y + b3_ref[...]                                          # fc3 (no activation)

    out_ref[...] = y.astype(out_ref.dtype)


def simple_nn_forward(x, w1, b1, w2, b2, w3, b3, *, block_b=None,
                      compute_dtype=jnp.bfloat16):
    """x: (B, input_dim). Weights are (in, out) (= PyTorch weight.T); biases (out,).
    Returns (B, output_dim) in x.dtype. MXU matmuls run in `compute_dtype` with f32
    accumulation (pass jnp.float32 for bit-faithful f32 compute)."""
    B, Din = x.shape
    H1 = w1.shape[1]
    H2 = w2.shape[1]
    Dout = w3.shape[1]
    Dout_pad = _round_up(Dout, 128)          # lane-dense output slab

    # --- parameters: cast/pad once in the wrapper (tiny arrays) --------------------
    w1c = w1.astype(compute_dtype)
    w2c = w2.astype(compute_dtype)
    w3c = w3.astype(compute_dtype)
    b1c = b1.astype(jnp.float32).reshape(1, H1)
    b2c = b2.astype(jnp.float32).reshape(1, H2)
    b3c = b3.astype(jnp.float32).reshape(1, Dout)
    if Dout_pad != Dout:
        w3c = jnp.pad(w3c, ((0, 0), (0, Dout_pad - Dout)))
        b3c = jnp.pad(b3c, ((0, 0), (0, Dout_pad - Dout)))

    # --- per-generation VMEM budget & batch tile ------------------------------------
    try:
        info = pltpu.get_tpu_info()
        vmem_cap = int(getattr(info, "vmem_capacity_bytes", 0)) or (64 << 20)
    except Exception:
        vmem_cap = 64 << 20                  # conservative (v7x per-TC) fallback
    vmem_limit = int(min((vmem_cap * 3) // 4, 96 << 20))   # 96 MiB on v5e/v6e, 48 MiB on v7x

    if block_b is None:
        # Per-row pipeline footprint: 2 x-bufs + 2 out-bufs + f32 hidden acts + bf16 x copy.
        per_row = (2 * Din * x.dtype.itemsize
                   + 2 * Dout_pad * x.dtype.itemsize
                   + (H1 + H2 + Dout_pad) * 4
                   + Din * jnp.dtype(compute_dtype).itemsize)
        budget = max(vmem_limit - (4 << 20), 1 << 20)       # headroom for weights/misc
        block_b = max(512, min(8192, (budget // per_row) // 8 * 8))

    # --- batch tiling ----------------------------------------------------------------
    # Rows are independent. Large ragged batches use a partial trailing block (no HBM
    # copy of x); only tiny batches that are not sublane-aligned get padded.
    tb = min(block_b, _round_up(max(B, 1), 8))
    x_in = x
    if tb > B:
        x_in = jnp.pad(x, ((0, tb - B), (0, 0)))
    rows = x_in.shape[0]
    grid = (pl.cdiv(rows, tb),)

    batch_map = lambda i: (i, 0)             # moves along the batch axis
    resident = lambda i: (0, 0)              # weights/biases pinned in VMEM for all tiles

    out = pl.pallas_call(
        _mlp_kernel,
        out_shape=jax.ShapeDtypeStruct((rows, Dout_pad), x.dtype),
        grid=grid,
        in_specs=[
            pl.BlockSpec((tb, Din), batch_map),
            pl.BlockSpec((Din, H1), resident),
            pl.BlockSpec((1, H1), resident),
            pl.BlockSpec((H1, H2), resident),
            pl.BlockSpec((1, H2), resident),
            pl.BlockSpec((H2, Dout_pad), resident),
            pl.BlockSpec((1, Dout_pad), resident),
        ],
        out_specs=pl.BlockSpec((tb, Dout_pad), batch_map),
        compiler_params=pltpu.CompilerParams(
            dimension_semantics=("parallel",),
            vmem_limit_bytes=vmem_limit,
        ),
    )(x_in, w1c, b1c, w2c, b2c, w3c, b3c)

    return out[:B, :Dout]


def _reference(x, w1, b1, w2, b2, w3, b3):
    h = jnp.maximum(x @ w1 + b1, 0.0)
    h = jnp.maximum(h @ w2 + b2, 0.0)
    return h @ w3 + b3


if __name__ == "__main__":
    key = jax.random.PRNGKey(0)
    ks = jax.random.split(key, 7)

    B, input_dim, output_dim = 8, 32, 10   # small demo shapes consistent with the module
    x = jax.random.normal(ks[0], (B, input_dim), dtype=jnp.float32)
    w1 = jax.random.normal(ks[1], (input_dim, 128), dtype=jnp.float32) * 0.1
    b1 = jax.random.normal(ks[2], (128,), dtype=jnp.float32) * 0.1
    w2 = jax.random.normal(ks[3], (128, 64), dtype=jnp.float32) * 0.1
    b2 = jax.random.normal(ks[4], (64,), dtype=jnp.float32) * 0.1
    w3 = jax.random.normal(ks[5], (64, output_dim), dtype=jnp.float32) * 0.1
    b3 = jax.random.normal(ks[6], (output_dim,), dtype=jnp.float32) * 0.1

    y = simple_nn_forward(x, w1, b1, w2, b2, w3, b3)
    y = jax.block_until_ready(y)

    ref = _reference(x, w1, b1, w2, b2, w3, b3)
    assert y.shape == (B, output_dim), y.shape
    # bf16 MXU operands with f32 accumulation -> tolerance loosened vs the f32 reference.
    assert jnp.allclose(y.astype(jnp.float32), ref, atol=5e-2, rtol=5e-2), (y, ref)
    print("KERNEL_OK")
</pallas_src>

<mosaic_0001>
module attributes {stable_mosaic.version = 11 : i64} {
  func.func @_mlp_kernel(%arg0: i32, %arg1: memref<8x32xf32, #tpu.memory_space<vmem>>, %arg2: memref<32x128xbf16, #tpu.memory_space<vmem>>, %arg3: memref<1x128xf32, #tpu.memory_space<vmem>>, %arg4: memref<128x64xbf16, #tpu.memory_space<vmem>>, %arg5: memref<1x64xf32, #tpu.memory_space<vmem>>, %arg6: memref<64x128xbf16, #tpu.memory_space<vmem>>, %arg7: memref<1x128xf32, #tpu.memory_space<vmem>>, %arg8: memref<8x128xf32, #tpu.memory_space<vmem>>) attributes {dimension_semantics = [#tpu.dimension_semantics<parallel>], iteration_bounds = array<i64: 1>, scalar_prefetch = 0 : i64, scratch_operands = 0 : i64, tpu.core_type = #tpu.core_type<tc>, window_params = [{transform_indices = @transform_0, window_bounds = array<i64: 8, 32>}, {pipeline_mode = #tpu.pipeline_mode<synchronous>, transform_indices = @transform_1, window_bounds = array<i64: 32, 128>}, {pipeline_mode = #tpu.pipeline_mode<synchronous>, transform_indices = @transform_2, window_bounds = array<i64: 1, 128>}, {pipeline_mode = #tpu.pipeline_mode<synchronous>, transform_indices = @transform_3, window_bounds = array<i64: 128, 64>}, {pipeline_mode = #tpu.pipeline_mode<synchronous>, transform_indices = @transform_4, window_bounds = array<i64: 1, 64>}, {pipeline_mode = #tpu.pipeline_mode<synchronous>, transform_indices = @transform_5, window_bounds = array<i64: 64, 128>}, {pipeline_mode = #tpu.pipeline_mode<synchronous>, transform_indices = @transform_6, window_bounds = array<i64: 1, 128>}, {transform_indices = @transform_7, window_bounds = array<i64: 8, 128>}]} {
    %c0 = arith.constant 0 : index
    %c0_0 = arith.constant 0 : index
    %0 = vector.load %arg1[%c0, %c0_0] : memref<8x32xf32, #tpu.memory_space<vmem>>, vector<8x32xf32>
    %1 = arith.truncf %0 : vector<8x32xf32> to vector<8x32xbf16>
    %c0_1 = arith.constant 0 : index
    %c0_2 = arith.constant 0 : index
    %2 = vector.load %arg2[%c0_1, %c0_2] : memref<32x128xbf16, #tpu.memory_space<vmem>>, vector<32x128xbf16>
    %cst = arith.constant dense<0.000000e+00> : vector<8x128xf32>
    %3 = tpu.matmul %1, %2, %cst {dimension_numbers = #tpu.dot_dimension_numbers<[1], [0], [0], [1], [0, 0, 1, 1], [], []>} : vector<8x32xbf16>, vector<32x128xbf16>, vector<8x128xf32> -> vector<8x128xf32>
    %c0_3 = arith.constant 0 : index
    %c0_4 = arith.constant 0 : index
    %4 = vector.load %arg3[%c0_3, %c0_4] : memref<1x128xf32, #tpu.memory_space<vmem>>, vector<1x128xf32>
    %5 = vector.broadcast %4 : vector<1x128xf32> to vector<8x128xf32>
    %6 = arith.addf %3, %5 : vector<8x128xf32>
    %cst_5 = arith.constant 0.000000e+00 : f32
    %7 = vector.broadcast %cst_5 : f32 to vector<8x128xf32>
    %8 = arith.maximumf %6, %7 : vector<8x128xf32>
    %9 = arith.truncf %8 : vector<8x128xf32> to vector<8x128xbf16>
    %c0_6 = arith.constant 0 : index
    %c0_7 = arith.constant 0 : index
    %10 = vector.load %arg4[%c0_6, %c0_7] : memref<128x64xbf16, #tpu.memory_space<vmem>>, vector<128x64xbf16>
    %cst_8 = arith.constant dense<0.000000e+00> : vector<8x64xf32>
    %11 = tpu.matmul %9, %10, %cst_8 {dimension_numbers = #tpu.dot_dimension_numbers<[1], [0], [0], [1], [0, 0, 1, 1], [], []>} : vector<8x128xbf16>, vector<128x64xbf16>, vector<8x64xf32> -> vector<8x64xf32>
    %c0_9 = arith.constant 0 : index
    %c0_10 = arith.constant 0 : index
    %12 = vector.load %arg5[%c0_9, %c0_10] : memref<1x64xf32, #tpu.memory_space<vmem>>, vector<1x64xf32>
    %13 = vector.broadcast %12 : vector<1x64xf32> to vector<8x64xf32>
    %14 = arith.addf %11, %13 : vector<8x64xf32>
    %cst_11 = arith.constant 0.000000e+00 : f32
    %15 = vector.broadcast %cst_11 : f32 to vector<8x64xf32>
    %16 = arith.maximumf %14, %15 : vector<8x64xf32>
    %17 = arith.truncf %16 : vector<8x64xf32> to vector<8x64xbf16>
    %c0_12 = arith.constant 0 : index
    %c0_13 = arith.constant 0 : index
    %18 = vector.load %arg6[%c0_12, %c0_13] : memref<64x128xbf16, #tpu.memory_space<vmem>>, vector<64x128xbf16>
    %cst_14 = arith.constant dense<0.000000e+00> : vector<8x128xf32>
    %19 = tpu.matmul %17, %18, %cst_14 {dimension_numbers = #tpu.dot_dimension_numbers<[1], [0], [0], [1], [0, 0, 1, 1], [], []>} : vector<8x64xbf16>, vector<64x128xbf16>, vector<8x128xf32> -> vector<8x128xf32>
    %c0_15 = arith.constant 0 : index
    %c0_16 = arith.constant 0 : index
    %20 = vector.load %arg7[%c0_15, %c0_16] : memref<1x128xf32, #tpu.memory_space<vmem>>, vector<1x128xf32>
    %21 = vector.broadcast %20 : vector<1x128xf32> to vector<8x128xf32>
    %22 = arith.addf %19, %21 : vector<8x128xf32>
    %c0_17 = arith.constant 0 : index
    %c0_18 = arith.constant 0 : index
    %23 = vector.load %arg8[%c0_17, %c0_18] : memref<8x128xf32, #tpu.memory_space<vmem>>, vector<8x128xf32>
    tpu.vector_store %arg8[%c0_17, %c0_18], %22 {strides = array<i32>} : memref<8x128xf32, #tpu.memory_space<vmem>>, vector<8x128xf32>,
    return
  }
  func.func @transform_0(%arg0: i32) -> (i32, i32) {
    %c0_i32 = arith.constant 0 : i32
    %c0_i32_0 = arith.constant 0 : i32
    return %arg0, %c0_i32 : i32, i32
  }
  func.func @transform_1(%arg0: i32) -> (i32, i32) {
    %c0_i32 = arith.constant 0 : i32
    %c0_i32_0 = arith.constant 0 : i32
    %c0_i32_1 = arith.constant 0 : i32
    return %c0_i32, %c0_i32_0 : i32, i32
  }
  func.func @transform_2(%arg0: i32) -> (i32, i32) {
    %c0_i32 = arith.constant 0 : i32
    %c0_i32_0 = arith.constant 0 : i32
    %c0_i32_1 = arith.constant 0 : i32
    return %c0_i32, %c0_i32_0 : i32, i32
  }
  func.func @transform_3(%arg0: i32) -> (i32, i32) {
    %c0_i32 = arith.constant 0 : i32
    %c0_i32_0 = arith.constant 0 : i32
    %c0_i32_1 = arith.constant 0 : i32
    return %c0_i32, %c0_i32_0 : i32, i32
  }
  func.func @transform_4(%arg0: i32) -> (i32, i32) {
    %c0_i32 = arith.constant 0 : i32
    %c0_i32_0 = arith.constant 0 : i32
    %c0_i32_1 = arith.constant 0 : i32
    return %c0_i32, %c0_i32_0 : i32, i32
  }
  func.func @transform_5(%arg0: i32) -> (i32, i32) {
    %c0_i32 = arith.constant 0 : i32
    %c0_i32_0 = arith.constant 0 : i32
    %c0_i32_1 = arith.constant 0 : i32
    return %c0_i32, %c0_i32_0 : i32, i32
  }
  func.func @transform_6(%arg0: i32) -> (i32, i32) {
    %c0_i32 = arith.constant 0 : i32
    %c0_i32_0 = arith.constant 0 : i32
    %c0_i32_1 = arith.constant 0 : i32
    return %c0_i32, %c0_i32_0 : i32, i32
  }
  func.func @transform_7(%arg0: i32) -> (i32, i32) {
    %c0_i32 = arith.constant 0 : i32
    %c0_i32_0 = arith.constant 0 : i32
    return %arg0, %c0_i32 : i32, i32
  }
}

</mosaic_0001>

<bundles_post_ra>
// kernel: tpu_custom_call.1
= control target key start
LH: loop header
LB: loop body
LE: loop exit
PB: predicated region body
PF: predicated region fallthrough
CT: control target
= control target key end

     0   :  { %v427_v1 = vmov 0.0   ;;  %vm428_vm0 = vmmov 0   ;;  %vm53_vm1 = vcmask 261120   ;;  %s539_s0 = inlined_call_operand.vmem [shape: f32[8,32], index: 0, kind: input, shape index: {}]   ;;  %s540_s1 = inlined_call_operand.vmem [shape: bf16[32,128], index: 1, kind: input, shape index: {}]   ;;  %s541_s2 = inlined_call_operand.vmem [shape: f32[1,128], index: 2, kind: input, shape index: {}]   ;;  %s542_s3 = inlined_call_operand.vmem [shape: bf16[128,64], index: 3, kind: input, shape index: {}]   ;;  %s543_s4 = inlined_call_operand.vmem [shape: f32[1,64], index: 4, kind: input, shape index: {}]   ;;  %s544_s5 = inlined_call_operand.vmem [shape: bf16[64,128], index: 5, kind: input, shape index: {}]   ;;  %s545_s6 = inlined_call_operand.vmem [shape: f32[1,128], index: 6, kind: input, shape index: {}]   ;;  %s546_s7 = inlined_call_operand.hbm [shape: f32[8,128], index: 7, kind: output, shape index: {}]  }
   0x1   :  { %v389_v0 = vld [vmem:[%s540_s1] sm:$0xff]   ;;  %346 = vmatprep.subr.bf16.mxu0 %v427_v1  ;;  %v390_v2 = vld [vmem:[%s540_s1 + $0x8] sm:$0xff]   ;;  %354 = vmatprep.subr.bf16.mxu1 %v427_v1  ;;  %v393_v7 = vld [vmem:[%s542_s3 + $0x10] sm:$0xff]  }
   0x2   :  { %347 = vmatpush3.bf16.msra.mxu0 %v389_v0  ;;  %350 = vmatprep.mubr.msk.bf16.mxu0 %vm428_vm0, %v427_v1  ;;  %v28_v3 = vld [vmem:[%s539_s0] sm:$0xff]  ;;  %v392_v6 = vld [vmem:[%s542_s3 + $0x8] sm:$0xff]  }
   0x3   :  { %348 = vmatprep.subr.bf16.mxu0 %v427_v1  ;;  %v391_v4 = vld [vmem:[%s542_s3] sm:$0xff]   ;;  %370 = vmatprep.mubr.msk.bf16.mxu1 %vm428_vm0, %v427_v1  ;;  %v29_v5 = vpack.c.bf16 %v28_v3, %v28_v3 }
   0x4   :  { %355 = vmatpush3.bf16.msra.mxu1 %v391_v4 }
   0x5   :  { %356 = vmatprep.subr.bf16.mxu1 %v427_v1 }
   0x6   :  { %349 = vmatpush3.bf16.msra.mxu0 %v390_v2 }
   0x7   :  { %374 = vmatprep.subr.bf16.mxu0 %v427_v1 }
   0x8   :  { %357 = vmatpush3.bf16.msra.mxu1 %v392_v6 }
   0x9   :  { %351 = vmatmul.mubr.msk.bf16.vlgmr.msra.gmra.mrb[0].mxu0 %vm53_vm1, %v29_v5  ;;  %358 = vmatprep.subr.bf16.mxu1 %v427_v1 }
   0xa   :  { %382 = vmatprep.mubr.msk.bf16.mxu0 %vm428_vm0, %v427_v1 }
   0xb   :  { %12 = vsyncpa [#allocation3], 0  ;;  %v394_v8 = vld [vmem:[%s542_s3 + $0x18] sm:$0xff]   ;;  %v395_v9 = vld [vmem:[%s542_s3 + $0x20] sm:$0xff]   ;;  %vm251_vm2 = vcmask 523264   ;;  %s429_s1 = smov [#allocation2]  }
   0xc   :  { %359 = vmatpush3.bf16.msra.mxu1 %v393_v7  ;;  %v396_v10 = vld [vmem:[%s542_s3 + $0x28] sm:$0xff]   ;;  %v397_v11 = vld [vmem:[%s542_s3 + $0x30] sm:$0xff]   ;;  %v398_v12 = vld [vmem:[%s542_s3 + $0x38] sm:$0xff]  }
   0xd   :  { %360 = vmatprep.subr.bf16.mxu1 %v427_v1  ;;  %v399_v13 = vld [vmem:[%s544_s5] sm:$0xff]   ;;  %v400_v14 = vld [vmem:[%s544_s5 + $0x8] sm:$0xff]   ;;  %v401_v23 = vld [vmem:[%s544_s5 + $0x10] sm:$0xff]  }
   0xe   :  { %375 = vmatpush3.bf16.msra.mxu0 %v399_v13  ;;  %v310_v15 = vld [vmem:[%s541_s2] ss:$0 sm:$0xff]  ;;  %v402_v24 = vld [vmem:[%s544_s5 + $0x18] sm:$0xff]   ;;  %s302_s5 = sshll.u32 %s429_s1, 4  ;;  %s303_s5 = int_to_ptr.vmem [resolvable:$true] %s302_s5 }
   0xf   :  { %376 = vmatprep.subr.bf16.mxu0 %v427_v1  ;;  %v314_v25 = vld [vmem:[%s543_s4] ss:$0 sm:$0xff]  ;;  %s403_s4 = scalar_lea.vmem %s303_s5, 128  ;;  %p408_p1 = scmp.lt.s32.totalorder %s303_s5, %s303_s5 }
  0x10   :  { %361 = vmatpush3.bf16.msra.mxu1 %v394_v8  ;;  %v323_v33 = vld [vmem:[%s545_s6] ss:$0 sm:$0xff]  ;;  %p404_p0 = scmp.ne.s32.totalorder %s303_s5, %s403_s4  ;;  %p409_p2 = scmp.lt.s32.totalorder %s403_s4, %s403_s4 }
  0x11   :  { %362 = vmatprep.subr.bf16.mxu1 %v427_v1 }
  0x12   :  { %377 = vmatpush3.bf16.msra.mxu0 %v400_v14  ;;  %p410_p3 = por %p409_p2, %p408_p1 }
  0x13   :  { %378 = vmatprep.subr.bf16.mxu0 %v427_v1 }
  0x14   :  { %363 = vmatpush3.bf16.msra.mxu1 %v395_v9  ;;  %p411_p4 = pnand %p410_p3, %p404_p0 }
  0x15   :  { %364 = vmatprep.subr.bf16.mxu1 %v427_v1 }
  0x16   :  { %379 = vmatpush3.bf16.msra.mxu0 %v401_v23 }
  0x17   :  { %380 = vmatprep.subr.bf16.mxu0 %v427_v1 }
  0x18   :  { %365 = vmatpush3.bf16.msra.mxu1 %v396_v10 }
  0x19   :  { %366 = vmatprep.subr.bf16.mxu1 %v427_v1 }
  0x1a   :  { %381 = vmatpush3.bf16.msra.mxu0 %v402_v24 }
  0x1c   :  { %367 = vmatpush3.bf16.msra.mxu1 %v397_v11 }
  0x1d   :  { %368 = vmatprep.subr.bf16.mxu1 %v427_v1 }
  0x20   :  { %369 = vmatpush3.bf16.msra.mxu1 %v398_v12 }
  0xdc   :  { %v91_v16 = vpop.f32.mrb[0].mxu0 }
  0xdd   :  { %v92_v17 = vadd.f32 %v310_v15, %v91_v16  ;;  %v352_v18 = vpop.f32.mrb[1].mxu0 }
  0xde   :  { %v94_v19 = vpop.f32.mrb[2].mxu0 }
  0xdf   :  { %v97_v20 = vmax.f32 %v92_v17, 0.0  ;;  %v353_v21 = vpop.f32.mrb[3].mxu0 }
  0xe1   :  { %v98_v22 = vpack.c.bf16 %v97_v20, %v97_v20 }
  0xe3   :  { %371 = vmatmul.mubr.bf16.vlgmr.msra.gmra.mrb[0].mxu1 %v98_v22 }
 0x1b6   :  { %v204_v26 = vpop.f32.mrb[0].mxu1 }
 0x1b7   :  { %v205_v27 = vadd.f32 %v314_v25, %v204_v26  ;;  %v372_v28 = vpop.f32.mrb[1].mxu1 }
 0x1b8   :  { %v207_v29 = vpop.f32.mrb[2].mxu1 }
 0x1b9   :  { %v210_v30 = vmax.f32 %v205_v27, 0.0  ;;  %v373_v31 = vpop.f32.mrb[3].mxu1 }
 0x1bb   :  { %v211_v32 = vpack.c.bf16 %v210_v30, %v210_v30 }
 0x1bd   :  { %383 = vmatmul.mubr.msk.bf16.vlgmr.msra.gmra.mrb[4].mxu0 %vm251_vm2, %v211_v32 }
 0x290   :  { %v289_v34 = vpop.f32.mrb[4].mxu0 }
 0x291   :  { %v290_v35 = vadd.f32 %v323_v33, %v289_v34  ;;  %v384_v36 = vpop.f32.mrb[5].mxu0 }
 0x292   :  { %v292_v37 = vpop.f32.mrb[6].mxu0 }
 0x293   :  { %295 = vst [vmem:[#allocation2] sm:$0xff] %v290_v35  ;;  %v385_v38 = vpop.f32.mrb[7].mxu0 }
 0x294   :  { %414 = shalt.err (!%p411_p4)
}
 0x295   :  { %s415_s6 = scalar_lea.hbm %s546_s7, 128 }
 0x296   :  { %p416_p5 = scmp.ne.s32.totalorder %s546_s7, %s415_s6  ;;  %p419_p6 = scmp.lt.u32.totalorder %s415_s6, %s546_s7 }
 0x298   :  { %p421_p7 = pnand %p419_p6, %p416_p5 }
 0x29a   :  { %424 = shalt.err (!%p421_p7)
}
 0x29b   :  { %305 = dma.vmem_to_hbm [thread:$0]  %s303_s5, 128, %s546_s7, [#allocation3]  }
 0x29c   :  { %425 = dma.done.wait [#allocation3], 128  }
 0x29d   :  { %426 = vsyncadd [#allocation3], 4294967168 }
 0x29e   :  { %309 = vsyncpa [#allocation3], 1 }

</bundles_post_ra>
